<compile_context>
chip_gen: v7x
topology: tpu7x:2x2x1
jax: 0.10.0
libtpu: 0.0.40
codegen_flags: <defaults>
</compile_context>

<pallas_src>
import jax
import jax.numpy as jnp
from jax.experimental import pallas as pl
from jax.experimental.pallas import tpu as pltpu

_SHIFT = 3.0 / 8.0          # the +3/8 / -3/8 offsets from Q_HSwish.forward
_TILE_BYTES = 1 << 20       # ~1 MiB per input tile (x2 double buffer, x2 in/out
                            # => ~4 MiB VMEM, well under the 16 MiB v5e default)


def _q_hswish_lsq_kernel(scal_ref, x_ref, o_ref):
    # scal_ref: (3,) f32 in SMEM = [1/alpha, n_lv, alpha/n_lv]
    inv_alpha = scal_ref[0]
    n_lv = scal_ref[1]
    step = scal_ref[2]

    x = x_ref[...].astype(jnp.float32)
    data = x + _SHIFT
    # hardtanh(data / alpha, -1, 1) * n_lv   (divide -> multiply by 1/alpha)
    q = jnp.clip(data * inv_alpha, -1.0, 1.0) * n_lv
    # forward value of (q.round() + (q - q.detach())) * (alpha / n_lv) - 3/8
    o_ref[...] = (jnp.round(q) * step - _SHIFT).astype(o_ref.dtype)


def q_hswish_forward(x, bit_param, alpha_param, *, quant=True, training=False,
                     noise=True, is_stochastic=True, is_discretize=True,
                     min_kernel_elems=1 << 16):
    """Forward pass of nipq.Q_HSwish (deterministic / eval LSQ path)."""
    if not quant:
        return x

    # TODO(synk): training+noise stochastic branch (histc/multinomial) is not
    # implemented; training callers with noise=True get the deterministic path.

    # ---- scalar parameter glue (matches noise_quant, sym=True) ----
    bit = 2.0 + jax.nn.sigmoid(bit_param.astype(jnp.float32)) * 12.0
    if (not training) or is_discretize:
        bit = jnp.round(bit)
    bit = jnp.round(bit)                      # lsq_forward receives bit.round()
    alpha = jax.nn.softplus(alpha_param.astype(jnp.float32))
    n_lv = 2.0 ** (bit - 1.0) - 1.0           # sym=True
    inv_alpha = 1.0 / alpha
    step = alpha / n_lv

    def _jnp_path(xx):
        # Fused-XLA fallback for tiny or ragged inputs (kernel-launch overhead
        # dominates below ~64K elements).
        d = xx.astype(jnp.float32) + _SHIFT
        q = jnp.clip(d * inv_alpha, -1.0, 1.0) * n_lv
        return (jnp.round(q) * step - _SHIFT).astype(xx.dtype)

    total = int(x.size)
    lane = None
    for w in (1024, 512, 256, 128):
        if total % w == 0:
            lane = w
            break
    if total < min_kernel_elems or lane is None:
        return _jnp_path(x)

    orig_shape = x.shape
    rows = total // lane
    x2d = x.reshape(rows, lane)                  # free reshape, native dtype

    # ---- tile sizing: ~1 MiB input tile, row-block multiple of 16 ----
    itemsize = x.dtype.itemsize
    tgt = max(16, _TILE_BYTES // (lane * itemsize))
    tgt -= tgt % 16                              # bf16 sublane packing needs 16
    if rows <= tgt:
        block_rows = rows                        # full extent: always legal
    else:
        block_rows = tgt
    grid = (pl.cdiv(rows, block_rows),)          # ragged last block handled

    scalars = jnp.concatenate([
        inv_alpha.reshape(1), n_lv.reshape(1), step.reshape(1)
    ]).astype(jnp.float32)

    out2d = pl.pallas_call(
        _q_hswish_lsq_kernel,
        out_shape=jax.ShapeDtypeStruct((rows, lane), x.dtype),
        grid=grid,
        in_specs=[
            pl.BlockSpec(memory_space=pltpu.SMEM),                 # scalars
            pl.BlockSpec((block_rows, lane), lambda i: (i, 0)),    # x tile
        ],
        out_specs=pl.BlockSpec((block_rows, lane), lambda i: (i, 0)),
        compiler_params=pltpu.CompilerParams(
            dimension_semantics=("parallel",)),
    )(scalars, x2d)

    return out2d.reshape(orig_shape)


def _reference(x, bit_param, alpha_param):
    bit = jnp.round(jnp.round(2.0 + jax.nn.sigmoid(bit_param) * 12.0))
    alpha = jax.nn.softplus(alpha_param)
    n_lv = 2.0 ** (bit - 1.0) - 1.0
    data = x.astype(jnp.float32) + _SHIFT
    q = jnp.clip(data / alpha, -1.0, 1.0) * n_lv
    return (jnp.round(q) * (alpha / n_lv) - _SHIFT).astype(x.dtype)


if __name__ == "__main__":
    key = jax.random.PRNGKey(0)
    k1, k2 = jax.random.split(key)

    # Deterministic parameter init per Q_HSwish.__init__: bit = zeros(1), alpha = 6.0
    bit_param = jnp.zeros((1,), dtype=jnp.float32)
    alpha_param = jnp.full((1,), 6.0, dtype=jnp.float32)

    # --- small NCHW input (force the Pallas kernel; default would fall back) ---
    x = jax.random.normal(k1, (2, 4, 16, 16), dtype=jnp.float32) * 4.0
    out = q_hswish_forward(x, bit_param, alpha_param, quant=True,
                           training=False, min_kernel_elems=0)
    out = jax.block_until_ready(out)
    ref = _reference(x, bit_param, alpha_param)
    assert out.shape == x.shape and out.dtype == x.dtype
    assert jnp.allclose(out, ref, atol=1e-5, rtol=1e-5)

    # --- bf16 stays bf16 end-to-end through the kernel ---
    xb = x.astype(jnp.bfloat16)
    outb = jax.block_until_ready(
        q_hswish_forward(xb, bit_param, alpha_param, quant=True,
                         training=False, min_kernel_elems=0))
    refb = _reference(xb, bit_param, alpha_param)
    assert outb.dtype == jnp.bfloat16
    assert jnp.allclose(outb.astype(jnp.float32), refb.astype(jnp.float32),
                        atol=5e-2, rtol=5e-2)

    # --- medium input: exercises multi-step grid (big tiles, pipelined) ---
    xm = jax.random.normal(k2, (16, 32, 32, 32), dtype=jnp.float32) * 4.0
    outm = jax.block_until_ready(
        q_hswish_forward(xm, bit_param, alpha_param, quant=True, training=False))
    refm = _reference(xm, bit_param, alpha_param)
    assert jnp.allclose(outm, refm, atol=1e-5, rtol=1e-5)

    # --- tiny-input fallback path parity and quant=False identity ---
    out_fb = q_hswish_forward(x, bit_param, alpha_param, quant=True, training=False)
    assert jnp.allclose(out_fb, ref, atol=1e-5, rtol=1e-5)
    ident = q_hswish_forward(x, bit_param, alpha_param, quant=False)
    assert jnp.array_equal(ident, x)

    print("KERNEL_OK")
</pallas_src>

<mosaic_0001>
module attributes {stable_mosaic.version = 11 : i64} {
  func.func @_q_hswish_lsq_kernel(%arg0: i32, %arg1: memref<3xf32, #tpu.memory_space<smem>>, %arg2: memref<2x1024xf32, #tpu.memory_space<vmem>>, %arg3: memref<2x1024xf32, #tpu.memory_space<vmem>>) attributes {dimension_semantics = [#tpu.dimension_semantics<parallel>], iteration_bounds = array<i64: 1>, scalar_prefetch = 0 : i64, scratch_operands = 0 : i64, tpu.core_type = #tpu.core_type<tc>, window_params = [{transform_indices = @transform_0, window_bounds = array<i64: 3>}, {transform_indices = @transform_1, window_bounds = array<i64: 2, 1024>}, {transform_indices = @transform_2, window_bounds = array<i64: 2, 1024>}]} {
    %c0 = arith.constant 0 : index
    %0 = memref.load %arg1[%c0] : memref<3xf32, #tpu.memory_space<smem>>
    %c1 = arith.constant 1 : index
    %1 = memref.load %arg1[%c1] : memref<3xf32, #tpu.memory_space<smem>>
    %c2 = arith.constant 2 : index
    %2 = memref.load %arg1[%c2] : memref<3xf32, #tpu.memory_space<smem>>
    %c0_0 = arith.constant 0 : index
    %c0_1 = arith.constant 0 : index
    %3 = vector.load %arg2[%c0_0, %c0_1] : memref<2x1024xf32, #tpu.memory_space<vmem>>, vector<2x1024xf32>
    %cst = arith.constant 3.750000e-01 : f32
    %4 = vector.broadcast %cst : f32 to vector<2x1024xf32>
    %5 = arith.addf %3, %4 : vector<2x1024xf32>
    %6 = vector.broadcast %0 : f32 to vector<2x1024xf32>
    %7 = arith.mulf %5, %6 : vector<2x1024xf32>
    %cst_2 = arith.constant -1.000000e+00 : f32
    %cst_3 = arith.constant 1.000000e+00 : f32
    %8 = vector.broadcast %cst_2 : f32 to vector<2x1024xf32>
    %9 = arith.maximumf %8, %7 : vector<2x1024xf32>
    %10 = vector.broadcast %cst_3 : f32 to vector<2x1024xf32>
    %11 = arith.minimumf %10, %9 : vector<2x1024xf32>
    %12 = vector.broadcast %1 : f32 to vector<2x1024xf32>
    %13 = arith.mulf %11, %12 : vector<2x1024xf32>
    %14 = math.roundeven %13 : vector<2x1024xf32>
    %15 = vector.broadcast %2 : f32 to vector<2x1024xf32>
    %16 = arith.mulf %14, %15 : vector<2x1024xf32>
    %cst_4 = arith.constant 3.750000e-01 : f32
    %17 = vector.broadcast %cst_4 : f32 to vector<2x1024xf32>
    %18 = arith.subf %16, %17 : vector<2x1024xf32>
    %c0_5 = arith.constant 0 : index
    %c0_6 = arith.constant 0 : index
    %19 = vector.load %arg3[%c0_5, %c0_6] : memref<2x1024xf32, #tpu.memory_space<vmem>>, vector<2x1024xf32>
    tpu.vector_store %arg3[%c0_5, %c0_6], %18 {strides = array<i32>} : memref<2x1024xf32, #tpu.memory_space<vmem>>, vector<2x1024xf32>,
    return
  }
  func.func @transform_0(%arg0: i32) -> i32 {
    %c0_i32 = arith.constant 0 : i32
    %c0_i32_0 = arith.constant 0 : i32
    return %c0_i32 : i32
  }
  func.func @transform_1(%arg0: i32) -> (i32, i32) {
    %c0_i32 = arith.constant 0 : i32
    %c0_i32_0 = arith.constant 0 : i32
    return %arg0, %c0_i32 : i32, i32
  }
  func.func @transform_2(%arg0: i32) -> (i32, i32) {
    %c0_i32 = arith.constant 0 : i32
    %c0_i32_0 = arith.constant 0 : i32
    return %arg0, %c0_i32 : i32, i32
  }
}

</mosaic_0001>

<bundles_post_ra>
// kernel: tpu_custom_call.1
= control target key start
LH: loop header
LB: loop body
LE: loop exit
PB: predicated region body
PF: predicated region fallthrough
CT: control target
= control target key end

     0   :  { %7 = vsyncpa [#allocation5], 0  ;;  %s202_s0 = inlined_call_operand.hbm [shape: f32[3], index: 0, kind: input, shape index: {}]   ;;  %s203_s1 = inlined_call_operand.hbm [shape: f32[2,1024], index: 1, kind: input, shape index: {}]   ;;  %s204_s2 = inlined_call_operand.hbm [shape: f32[2,1024], index: 2, kind: output, shape index: {}]  }
   0x1   :  { %8 = vsyncpa [#allocation3], 0 }
   0x2   :  { %9 = vsyncpa [#allocation4], 0  ;;  %s88_s11 = scalar_lea.hbm %s202_s0, 16 }
   0x3   :  { %p89_p0 = scmp.ne.s32.totalorder %s202_s0, %s88_s11  ;;  %p92_p1 = scmp.lt.u32.totalorder %s88_s11, %s202_s0 }
   0x5   :  { %p94_p2 = pnand %p92_p1, %p89_p0 }
   0x7   :  { %97 = shalt.err (!%p94_p2)
}
   0x8   :  { %s148_s16 = smov [#allocation2]   ;;  %s149_s19 = smov [#allocation6]  }
   0x9   :  { %17 = dma.hbm_to_smem %s202_s0, 16, %s148_s16, [#allocation5]  }
   0xa   :  { %s24_s20 = sshll.u32 %s149_s19, 4  ;;  %s98_s23 = scalar_lea.hbm %s203_s1, 256  ;;  %s25_s20 = int_to_ptr.vmem [resolvable:$true] %s24_s20 }
   0xb   :  { %p99_p3 = scmp.ne.s32.totalorder %s203_s1, %s98_s23  ;;  %p102_p4 = scmp.lt.u32.totalorder %s98_s23, %s203_s1 }
   0xd   :  { %p104_p5 = pnand %p102_p4, %p99_p3 }
   0xf   :  { %107 = shalt.err (!%p104_p5)
}
  0x10   :  { %s108_s28 = scalar_lea.vmem %s25_s20, 256  ;;  %p113_p7 = scmp.lt.s32.totalorder %s25_s20, %s25_s20 }
  0x11   :  { %p109_p6 = scmp.ne.s32.totalorder %s25_s20, %s108_s28  ;;  %p114_p8 = scmp.lt.s32.totalorder %s108_s28, %s108_s28 }
  0x13   :  { %p115_p9 = por %p114_p8, %p113_p7 }
  0x15   :  { %p116_p10 = pnand %p115_p9, %p109_p6 }
  0x17   :  { %119 = shalt.err (!%p116_p10)
}
  0x18   :  { %27 = dma.hbm_to_vmem [thread:$0]  %s203_s1, 256, %s25_s20, [#allocation3]  }
  0x19   :  { %142 = dma.done.wait [#allocation5], 16  }
  0x1a   :  { %143 = vsyncadd [#allocation5], 4294967280 }
  0x1b   :  { %144 = dma.done.wait [#allocation3], 256  }
  0x1c   :  { %145 = vsyncadd [#allocation3], 4294967040 }
  0x1d   :  { %34 = sfence }
  0x1e   :  { %s35_s30 = sld [smem:[#allocation2]]  ;;  %s77_s3 = sld [smem:[#allocation2 + $0x1]]  ;;  %v38_v0 = vld [vmem:[#allocation6] sm:$0xff]  ;;  %v39_v1 = vld [vmem:[#allocation6 + $0x8] sm:$0xff] }
  0x1f   :  { %v40_v2 = vadd.f32 0.375, %v38_v0  ;;  %v41_v3 = vadd.f32 0.375, %v39_v1  ;;  %s78_s4 = sld [smem:[#allocation2 + $0x2]]  ;;  %s150_s1 = smov [#allocation7]  }
  0x20   :  { %s67_s5 = sshll.u32 %s150_s1, 4  ;;  %s68_s5 = int_to_ptr.vmem [resolvable:$true] %s67_s5 }
  0x21   :  { %s120_s6 = scalar_lea.vmem %s68_s5, 256  ;;  %p125_p12 = scmp.lt.s32.totalorder %s68_s5, %s68_s5 }
  0x22   :  { %p121_p11 = scmp.ne.s32.totalorder %s68_s5, %s120_s6  ;;  %p126_p13 = scmp.lt.s32.totalorder %s120_s6, %s120_s6 }
  0x24   :  { %v42_v4 = vstv %s35_s30  ;;  %v49_v7 = vstv %s77_s3  ;;  %p127_p0 = por %p126_p13, %p125_p12 }
  0x25   :  { %v43_v5 = vmul.f32 %v42_v4, %v40_v2  ;;  %v44_v6 = vmul.f32 %v42_v4, %v41_v3  ;;  %v54_v12 = vstv %s78_s4 }
  0x26   :  { %p128_p1 = pnand %p127_p0, %p121_p11 }
  0x27   :  { %v79_v8 = vclamps-f32 %v43_v5, 1.0  ;;  %v80_v9 = vclamps-f32 %v44_v6, 1.0 }
  0x29   :  { %v50_v10 = vmul.f32 %v79_v8, %v49_v7  ;;  %v51_v11 = vmul.f32 %v80_v9, %v49_v7 }
  0x2b   :  { %v83_v13 = vround.rtne.f32 %v50_v10  ;;  %v84_v14 = vround.rtne.f32 %v51_v11 }
  0x2d   :  { %v55_v15 = vmul.f32 %v83_v13, %v54_v12  ;;  %v56_v16 = vmul.f32 %v84_v14, %v54_v12 }
  0x2f   :  { %v81_v17 = vadd.f32 -0.375, %v55_v15  ;;  %v82_v18 = vadd.f32 -0.375, %v56_v16 }
  0x31   :  { %59 = vst [vmem:[#allocation7] sm:$0xff] %v81_v17  ;;  %60 = vst [vmem:[#allocation7 + $0x8] sm:$0xff] %v82_v18 }
  0x32   :  { %131 = shalt.err (!%p128_p1)
}
  0x33   :  { %s132_s9 = scalar_lea.hbm %s204_s2, 256 }
  0x34   :  { %p133_p2 = scmp.ne.s32.totalorder %s204_s2, %s132_s9  ;;  %p136_p3 = scmp.lt.u32.totalorder %s132_s9, %s204_s2 }
  0x36   :  { %p138_p4 = pnand %p136_p3, %p133_p2 }
  0x38   :  { %141 = shalt.err (!%p138_p4)
}
  0x39   :  { %70 = dma.vmem_to_hbm [thread:$0]  %s68_s5, 256, %s204_s2, [#allocation4]  }
  0x3a   :  { %146 = dma.done.wait [#allocation4], 256  }
  0x3b   :  { %147 = vsyncadd [#allocation4], 4294967040 }
  0x3c   :  { %74 = vsyncpa [#allocation3], 1 }
  0x3d   :  { %75 = vsyncpa [#allocation4], 1 }
  0x3e   :  { %76 = vsyncpa [#allocation5], 1 }

</bundles_post_ra>
